<compile_context>
chip_gen: v7x
topology: tpu7x:2x2x1
jax: 0.10.0
libtpu: 0.0.40
codegen_flags: <defaults>
</compile_context>

<pallas_src>
import functools

import jax
import jax.numpy as jnp
from jax.experimental import pallas as pl
from jax.experimental.pallas import tpu as pltpu


def _parabola_kernel(params_ref, out_ref, *, a, b, c):
    # Pure scalar path: two SMEM loads, a few scalar FLOPs, one SMEM store.
    p1 = params_ref[0]
    p2 = params_ref[1]
    out_ref[0] = a * p1 * p1 + b * p2 * p2 + c


def simple_2d_parabola(x, params, *, a=1.0, b=1.0, c=0.0):
    """Mirrors Simple2DParabola.forward.

    `x` is accepted (and ignored) to reproduce the module interface exactly.
    `params` is the pre-staged (2,) float32 array [param1, param2].
    Returns shape (1,) float32, matching the PyTorch module output.
    """
    del x  # forward does not depend on the input tensor
    out = pl.pallas_call(
        functools.partial(_parabola_kernel, a=float(a), b=float(b), c=float(c)),
        out_shape=jax.ShapeDtypeStruct((1,), jnp.float32),
        # Single scalar input and scalar output, both on the SMEM path:
        # no VMEM tiles, no vector load/store slots, no padded-tile DMAs.
        in_specs=[pl.BlockSpec(memory_space=pltpu.MemorySpace.SMEM)],
        out_specs=pl.BlockSpec(memory_space=pltpu.MemorySpace.SMEM),
    )(params)
    return out  # already shape (1,) float32


if __name__ == "__main__":
    key = jax.random.PRNGKey(0)
    kx, _ = jax.random.split(key)

    # Deterministic parameter init, matching the module defaults:
    #   initial_x = 1.0, initial_y = 1.0, a = 1.0, b = 1.0, c = 0.0
    param1 = jnp.array([1.0], dtype=jnp.float32)
    param2 = jnp.array([1.0], dtype=jnp.float32)
    a, b, c = 1.0, 1.0, 0.0

    # Pre-stage parameters ONCE in the final shape/dtype (perf-review item):
    # a single (2,) f32 array instead of two per-call reshape/convert ops.
    params = jnp.concatenate([param1, param2]).astype(jnp.float32)

    # Small dummy input (ignored by the forward pass, as in PyTorch).
    x = jax.random.normal(kx, (2, 4, 16, 16), dtype=jnp.float32)

    out = simple_2d_parabola(x, params, a=a, b=b, c=c)
    out = jax.block_until_ready(out)

    # Reference check in plain JAX.
    expected = a * param1 ** 2 + b * param2 ** 2 + c
    assert out.shape == (1,) and out.dtype == jnp.float32
    assert jnp.allclose(out, expected), (out, expected)

    print("KERNEL_OK")
</pallas_src>

<mosaic_0001>
module attributes {stable_mosaic.version = 11 : i64} {
  func.func @_parabola_kernel(%arg0: memref<2xf32, #tpu.memory_space<smem>>, %arg1: memref<1xf32, #tpu.memory_space<smem>>) attributes {dimension_semantics = [], scalar_prefetch = 0 : i64, scratch_operands = 0 : i64, tpu.core_type = #tpu.core_type<tc>} {
    %c0 = arith.constant 0 : index
    %0 = memref.load %arg0[%c0] : memref<2xf32, #tpu.memory_space<smem>>
    %c1 = arith.constant 1 : index
    %1 = memref.load %arg0[%c1] : memref<2xf32, #tpu.memory_space<smem>>
    %cst = arith.constant 1.000000e+00 : f32
    %2 = arith.mulf %cst, %0 : f32
    %3 = arith.mulf %2, %0 : f32
    %cst_0 = arith.constant 1.000000e+00 : f32
    %4 = arith.mulf %cst_0, %1 : f32
    %5 = arith.mulf %4, %1 : f32
    %6 = arith.addf %3, %5 : f32
    %cst_1 = arith.constant 0.000000e+00 : f32
    %7 = arith.addf %6, %cst_1 : f32
    %c0_2 = arith.constant 0 : index
    %8 = memref.load %arg1[%c0_2] : memref<1xf32, #tpu.memory_space<smem>>
    memref.store %7, %arg1[%c0_2] : memref<1xf32, #tpu.memory_space<smem>>
    return
  }
}

</mosaic_0001>

<bundles_post_ra>
// kernel: tpu_custom_call.1
= control target key start
LH: loop header
LB: loop body
LE: loop exit
PB: predicated region body
PF: predicated region fallthrough
CT: control target
= control target key end

     0   :  { %6 = vsyncpa [#allocation3], 0  ;;  %s105_s0 = inlined_call_operand.hbm [shape: f32[2], index: 0, kind: input, shape index: {}]   ;;  %s106_s1 = inlined_call_operand.hbm [shape: f32[1], index: 1, kind: output, shape index: {}]  }
   0x1   :  { %7 = vsyncpa [#allocation4], 0  ;;  %s45_s8 = scalar_lea.hbm %s105_s0, 16 }
   0x2   :  { %p46_p0 = scmp.ne.s32.totalorder %s105_s0, %s45_s8  ;;  %p49_p1 = scmp.lt.u32.totalorder %s45_s8, %s105_s0 }
   0x4   :  { %p51_p2 = pnand %p49_p1, %p46_p0 }
   0x6   :  { %54 = shalt.err (!%p51_p2)
}
   0x7   :  { %s69_s13 = smov [#allocation2]  }
   0x8   :  { %15 = dma.hbm_to_smem %s105_s0, 16, %s69_s13, [#allocation3]  }
   0x9   :  { %65 = dma.done.wait [#allocation3], 16  }
   0xa   :  { %66 = vsyncadd [#allocation3], 4294967280 }
   0xb   :  { %19 = sfence }
   0xc   :  { %s20_s16 = sld [smem:[#allocation2]]  ;;  %s42_s17 = sld [smem:[#allocation2 + $0x1]] }
   0xd   :  { %s55_s23 = scalar_lea.hbm %s106_s1, 16 }
   0xe   :  { %p56_p3 = scmp.ne.s32.totalorder %s106_s1, %s55_s23  ;;  %p59_p4 = scmp.lt.u32.totalorder %s55_s23, %s106_s1 }
  0x10   :  { %p61_p5 = pnand %p59_p4, %p56_p3 }
  0x12   :  { %s22_s18 = smul.f32 %s20_s16, %s20_s16 }
  0x13   :  { %s23_s19 = smul.f32 %s42_s17, %s42_s17 }
  0x15   :  { %s24_s20 = sadd.f32 %s23_s19, %s22_s18 }
  0x17   :  { %27 = sst [smem:[#allocation5]] %s24_s20 }
  0x18   :  { %64 = shalt.err (!%p61_p5)
}
  0x19   :  { %s70_s0 = smov [#allocation5]  }
  0x1a   :  { %35 = dma.smem_to_hbm %s70_s0, 16, %s106_s1, [#allocation4]  }
  0x1b   :  { %67 = dma.done.wait [#allocation4], 16  }
  0x1c   :  { %68 = vsyncadd [#allocation4], 4294967280 }
  0x1d   :  { %39 = sfence }
  0x1e   :  { %40 = vsyncpa [#allocation3], 1 }
  0x1f   :  { %41 = vsyncpa [#allocation4], 1 }

</bundles_post_ra>
